<compile_context>
chip_gen: v5e
topology: v5e:2x2
jax: 0.10.0
libtpu: 0.0.40
codegen_flags: <defaults>
</compile_context>

<pallas_src>
import functools

import jax
import jax.numpy as jnp
from jax.experimental import pallas as pl
from jax.experimental.pallas import tpu as pltpu

LANE = 128          # lane width / MXU contraction alignment
SUBLANE_BF16 = 16   # bf16 sublane pack (sublane-only dims need no more)


def _round_up(x, m):
    return (x + m - 1) // m * m


# ----------------------------------------------------------------------------
# Kernel: one batch tile, feature-major layout ([features, TB] activations).
# ----------------------------------------------------------------------------
def critic_kernel(state_ref, action_ref,
                  w1_ref, b1_ref,
                  w2_ref, b2_ref,
                  wa_ref, ba_ref,
                  wq_ref, bq_ref,
                  out_ref, *, h1, h2):
    eps = jnp.float32(1e-5)

    def layer_norm(x, n_true):
        # Two-pass, padding-aware LayerNorm over the (sublane) feature axis.
        # Zero-padded feature rows contribute 0 to the mean (they are exactly
        # zero) and are masked out of the variance, so stats are exact.
        hp = x.shape[0]
        inv_n = jnp.float32(1.0 / n_true)
        mu = jnp.sum(x, axis=0, keepdims=True) * inv_n
        d = x - mu
        if hp != n_true:
            mask = jax.lax.broadcasted_iota(jnp.int32, (hp, 1), 0) < n_true
            dm = jnp.where(mask, d, jnp.float32(0.0))
        else:
            dm = d
        var = jnp.sum(dm * dm, axis=0, keepdims=True) * inv_n
        return d * jax.lax.rsqrt(var + eps)

    # --- fc1 -> LayerNorm -> ReLU ----------------------------------- [h1p, TB]
    x = jnp.dot(w1_ref[...], state_ref[...], preferred_element_type=jnp.float32)
    x = layer_norm(x + b1_ref[...], h1)
    x = jnp.maximum(x, 0.0)

    # --- fc2 -> LayerNorm -------------------------------------------- [h2p, TB]
    x = jnp.dot(w2_ref[...], x.astype(jnp.bfloat16),
                preferred_element_type=jnp.float32)
    x = layer_norm(x + b2_ref[...], h2)

    # --- action branch: ReLU(Wa @ action + ba) ------------------------ [h2p, TB]
    a = jnp.dot(wa_ref[...], action_ref[...], preferred_element_type=jnp.float32)
    a = jnp.maximum(a + ba_ref[...], 0.0)

    # --- fuse + Q head: VPU multiply + sublane reduce -> lane-dense (1, TB)
    sa = jnp.maximum(x + a, 0.0)
    q = jnp.sum(sa * wq_ref[...], axis=0, keepdims=True) + bq_ref[0]
    out_ref[...] = q.astype(out_ref.dtype)


# ----------------------------------------------------------------------------
# One-time weight preparation (hoisted out of the per-call path).
# ----------------------------------------------------------------------------
def prepare_params(params):
    """Pad + bf16-cast the critic weights once; returns (arrays, meta)."""
    w1, b1, w2, b2, wa, ba, wq, bq = params   # PyTorch layout: w[out, in], b[out]
    h1, in_dim = w1.shape
    h2 = w2.shape[0]
    act_dim = wa.shape[1]

    in_p = _round_up(in_dim, LANE)        # lane (K) dim of fc1
    act_p = _round_up(act_dim, LANE)      # lane (K) dim of action_value
    h1p = _round_up(h1, LANE)             # lane (K) dim of fc2
    h2p = _round_up(h2, SUBLANE_BF16)     # sublane-only dim -> 16 is enough

    f32, bf16 = jnp.float32, jnp.bfloat16

    def pad2(x, r, c):
        return jnp.pad(x, ((0, r - x.shape[0]), (0, c - x.shape[1])))

    # Weights in PyTorch [out, in] layout are exactly the feature-major LHS.
    w1p = pad2(w1, h1p, in_p).astype(bf16)
    w2p = pad2(w2, h2p, h1p).astype(bf16)
    wap = pad2(wa, h2p, act_p).astype(bf16)
    b1p = jnp.pad(b1, (0, h1p - h1)).reshape(h1p, 1).astype(f32)
    b2p = jnp.pad(b2, (0, h2p - h2)).reshape(h2p, 1).astype(f32)
    bap = jnp.pad(ba, (0, h2p - h2)).reshape(h2p, 1).astype(f32)
    wqp = jnp.pad(wq.reshape(-1), (0, h2p - h2)).reshape(h2p, 1).astype(f32)
    bqp = bq.reshape(1).astype(f32)

    arrays = (w1p, b1p, w2p, b2p, wap, bap, wqp, bqp)
    meta = dict(in_dim=in_dim, act_dim=act_dim, h1=h1, h2=h2,
                in_p=in_p, act_p=act_p, h1p=h1p, h2p=h2p)
    return arrays, meta


def _choose_tb(B, block_b):
    """Batch tile: always a 128-multiple; >=2 grid steps when the padded batch
    exceeds one lane width (v7x megacore); large batches use block_b."""
    bp = _round_up(B, LANE)
    if bp <= LANE:
        return LANE
    half = max(LANE, (bp // 2) // LANE * LANE)
    return min(block_b, half)


# ----------------------------------------------------------------------------
# Forward wrapper: batch grid, lane-dense output.
# ----------------------------------------------------------------------------
def critic_forward(state, action, prepared, *, block_b=512,
                   vmem_limit_bytes=None, weight_pipeline=None):
    """Fused DDPG-critic forward.  state:[B,in], action:[B,na] -> q:[B,1].

    `prepared` comes from prepare_params (call once, reuse every step).
    v7x tip: pass weight_pipeline=pl.Buffered(1) to single-buffer the
    grid-resident weights (halves their VMEM footprint within 64 MiB VMEM),
    and set vmem_limit_bytes when hidden dims grow.
    """
    arrays, meta = prepared
    w1p, b1p, w2p, b2p, wap, bap, wqp, bqp = arrays
    B = state.shape[0]
    in_p, act_p = meta["in_p"], meta["act_p"]
    h1p, h2p = meta["h1p"], meta["h2p"]

    tb = _choose_tb(B, block_b)
    bp = _round_up(B, tb)

    bf16, f32 = jnp.bfloat16, jnp.float32

    # Per-call input prep (feature-major, batch on lanes, bf16 for the MXU).
    state_t = jnp.pad(
        state, ((0, bp - B), (0, in_p - meta["in_dim"]))).T.astype(bf16)
    action_t = jnp.pad(
        action, ((0, bp - B), (0, act_p - meta["act_dim"]))).T.astype(bf16)

    grid = (bp // tb,)
    kernel = functools.partial(critic_kernel, h1=meta["h1"], h2=meta["h2"])

    def batch_spec(rows):
        return pl.BlockSpec((rows, tb), lambda i: (0, i))

    def const_spec(shape):
        if weight_pipeline is None:
            return pl.BlockSpec(shape, lambda i: (0, 0))
        return pl.BlockSpec(shape, lambda i: (0, 0),
                            pipeline_mode=weight_pipeline)

    cp_kwargs = dict(dimension_semantics=("parallel",))
    if vmem_limit_bytes is not None:
        cp_kwargs["vmem_limit_bytes"] = vmem_limit_bytes

    q_row = pl.pallas_call(
        kernel,
        out_shape=jax.ShapeDtypeStruct((1, bp), f32),
        grid=grid,
        in_specs=[
            batch_spec(in_p),                                   # state_t
            batch_spec(act_p),                                  # action_t
            const_spec((h1p, in_p)),                            # w1 (bf16)
            const_spec((h1p, 1)),                               # b1
            const_spec((h2p, h1p)),                             # w2 (bf16)
            const_spec((h2p, 1)),                               # b2
            const_spec((h2p, act_p)),                           # wa (bf16)
            const_spec((h2p, 1)),                               # ba
            const_spec((h2p, 1)),                               # wq column (VPU)
            pl.BlockSpec(memory_space=pltpu.MemorySpace.SMEM),  # bq scalar
        ],
        out_specs=pl.BlockSpec((1, tb), lambda i: (0, i)),      # lane-dense Q row
        compiler_params=pltpu.CompilerParams(**cp_kwargs),
    )(state_t, action_t, w1p, b1p, w2p, b2p, wap, bap, wqp, bqp)

    return q_row[0, :B].reshape(B, 1)


# ----------------------------------------------------------------------------
# Deterministic parameter construction (mirrors __init__ shapes, PyTorch layout).
# ----------------------------------------------------------------------------
def init_params(key, input_dims, fc1_dims, fc2_dims, n_actions):
    ks = jax.random.split(key, 8)
    f1 = 1.0 / float(fc1_dims) ** 0.5   # fc1.weight.size()[0] == fc1_dims
    f2 = 1.0 / float(fc2_dims) ** 0.5   # fc2.weight.size()[0] == fc2_dims
    f3 = 0.003
    fa = 1.0 / float(n_actions) ** 0.5  # default-ish init for action_value

    def u(k, shape, lim):
        return jax.random.uniform(k, shape, jnp.float32, -lim, lim)

    w1 = u(ks[0], (fc1_dims, input_dims), f1)
    b1 = u(ks[1], (fc1_dims,), f1)
    w2 = u(ks[2], (fc2_dims, fc1_dims), f2)
    b2 = u(ks[3], (fc2_dims,), f2)
    wa = u(ks[4], (fc2_dims, n_actions), fa)
    ba = u(ks[5], (fc2_dims,), fa)
    wq = u(ks[6], (1, fc2_dims), f3)
    bq = u(ks[7], (1,), f3)
    return (w1, b1, w2, b2, wa, ba, wq, bq)


# Pure-JAX reference (PyTorch-style two-pass LayerNorm).  matmul_dtype=bfloat16
# mirrors the kernel's MXU precision; float32 is the exact module semantics.
def critic_ref(state, action, params, *, matmul_dtype=jnp.float32):
    w1, b1, w2, b2, wa, ba, wq, bq = params
    eps = 1e-5

    def ln(x):
        mu = jnp.mean(x, axis=-1, keepdims=True)
        var = jnp.mean(jnp.square(x - mu), axis=-1, keepdims=True)
        return (x - mu) * jax.lax.rsqrt(var + eps)

    def lin(x, w, b):
        return jnp.dot(x.astype(matmul_dtype), w.T.astype(matmul_dtype),
                       preferred_element_type=jnp.float32) + b

    x = jax.nn.relu(ln(lin(state, w1, b1)))
    x = ln(lin(x, w2, b2))
    a = jax.nn.relu(lin(action, wa, ba))
    sa = jax.nn.relu(x + a)
    return jnp.dot(sa, wq.T, preferred_element_type=jnp.float32) + bq


if __name__ == "__main__":
    # Small shapes consistent with the module's forward.
    B = 8
    input_dims = 32
    fc1_dims = 64
    fc2_dims = 64
    n_actions = 4

    key = jax.random.PRNGKey(0)
    kp, ks, ka = jax.random.split(key, 3)

    params = init_params(kp, input_dims, fc1_dims, fc2_dims, n_actions)
    state = jax.random.normal(ks, (B, input_dims), jnp.float32)
    action = jax.random.normal(ka, (B, n_actions), jnp.float32)

    # One-time weight prep (hoisted), then a jitted per-step forward.
    prepared = prepare_params(params)
    fwd = jax.jit(lambda s, a: critic_forward(s, a, prepared))

    q = jax.block_until_ready(fwd(state, action))
    assert q.shape == (B, 1)

    # Tight check against a reference that matches the kernel's bf16 matmuls.
    q_bf = critic_ref(state, action, params, matmul_dtype=jnp.bfloat16)
    assert jnp.allclose(q, q_bf, atol=1e-4, rtol=1e-4), "mismatch vs bf16 reference"

    # Loose check against full-f32 module semantics (bf16 rounding only).
    q_f32 = critic_ref(state, action, params, matmul_dtype=jnp.float32)
    assert jnp.allclose(q, q_f32, atol=2e-2, rtol=2e-2), "mismatch vs f32 reference"

    print("KERNEL_OK")
</pallas_src>

<mosaic_0001>
module attributes {stable_mosaic.version = 11 : i64} {
  func.func @critic_kernel(%arg0: i32, %arg1: memref<128x128xbf16, #tpu.memory_space<vmem>>, %arg2: memref<128x128xbf16, #tpu.memory_space<vmem>>, %arg3: memref<128x128xbf16, #tpu.memory_space<vmem>>, %arg4: memref<128x1xf32, #tpu.memory_space<vmem>>, %arg5: memref<64x128xbf16, #tpu.memory_space<vmem>>, %arg6: memref<64x1xf32, #tpu.memory_space<vmem>>, %arg7: memref<64x128xbf16, #tpu.memory_space<vmem>>, %arg8: memref<64x1xf32, #tpu.memory_space<vmem>>, %arg9: memref<64x1xf32, #tpu.memory_space<vmem>>, %arg10: memref<1xf32, #tpu.memory_space<smem>>, %arg11: memref<1x128xf32, #tpu.memory_space<vmem>>) attributes {dimension_semantics = [#tpu.dimension_semantics<parallel>], iteration_bounds = array<i64: 1>, scalar_prefetch = 0 : i64, scratch_operands = 0 : i64, tpu.core_type = #tpu.core_type<tc>, window_params = [{transform_indices = @transform_0, window_bounds = array<i64: 128, 128>}, {transform_indices = @transform_1, window_bounds = array<i64: 128, 128>}, {pipeline_mode = #tpu.pipeline_mode<synchronous>, transform_indices = @transform_2, window_bounds = array<i64: 128, 128>}, {pipeline_mode = #tpu.pipeline_mode<synchronous>, transform_indices = @transform_3, window_bounds = array<i64: 128, 1>}, {pipeline_mode = #tpu.pipeline_mode<synchronous>, transform_indices = @transform_4, window_bounds = array<i64: 64, 128>}, {pipeline_mode = #tpu.pipeline_mode<synchronous>, transform_indices = @transform_5, window_bounds = array<i64: 64, 1>}, {pipeline_mode = #tpu.pipeline_mode<synchronous>, transform_indices = @transform_6, window_bounds = array<i64: 64, 128>}, {pipeline_mode = #tpu.pipeline_mode<synchronous>, transform_indices = @transform_7, window_bounds = array<i64: 64, 1>}, {pipeline_mode = #tpu.pipeline_mode<synchronous>, transform_indices = @transform_8, window_bounds = array<i64: 64, 1>}, {transform_indices = @transform_9, window_bounds = array<i64: 1>}, {transform_indices = @transform_10, window_bounds = array<i64: 1, 128>}]} {
    %c0 = arith.constant 0 : index
    %c0_0 = arith.constant 0 : index
    %0 = vector.load %arg3[%c0, %c0_0] : memref<128x128xbf16, #tpu.memory_space<vmem>>, vector<128x128xbf16>
    %c0_1 = arith.constant 0 : index
    %c0_2 = arith.constant 0 : index
    %1 = vector.load %arg1[%c0_1, %c0_2] : memref<128x128xbf16, #tpu.memory_space<vmem>>, vector<128x128xbf16>
    %cst = arith.constant dense<0.000000e+00> : vector<128x128xf32>
    %2 = tpu.matmul %0, %1, %cst {dimension_numbers = #tpu.dot_dimension_numbers<[1], [0], [0], [1], [0, 0, 1, 1], [], []>} : vector<128x128xbf16>, vector<128x128xbf16>, vector<128x128xf32> -> vector<128x128xf32>
    %c0_3 = arith.constant 0 : index
    %c0_4 = arith.constant 0 : index
    %3 = vector.load %arg4[%c0_3, %c0_4] : memref<128x1xf32, #tpu.memory_space<vmem>>, vector<128x1xf32>
    %4 = vector.broadcast %3 : vector<128x1xf32> to vector<128x128xf32>
    %5 = arith.addf %2, %4 : vector<128x128xf32>
    %cst_5 = arith.constant dense<0.000000e+00> : vector<128xf32>
    %6 = vector.multi_reduction <add>, %5, %cst_5 [0] : vector<128x128xf32> to vector<128xf32>
    %7 = vector.shape_cast %6 : vector<128xf32> to vector<1x128xf32>
    %cst_6 = arith.constant 1.562500e-02 : f32
    %8 = vector.broadcast %cst_6 : f32 to vector<1x128xf32>
    %9 = arith.mulf %7, %8 : vector<1x128xf32>
    %10 = vector.broadcast %9 : vector<1x128xf32> to vector<128x128xf32>
    %11 = arith.subf %5, %10 : vector<128x128xf32>
    %12 = tpu.iota {dimensions = array<i32: 0>} : vector<128x1xi32>
    %c64_i32 = arith.constant 64 : i32
    %13 = vector.broadcast %c64_i32 : i32 to vector<128x1xi32>
    %14 = arith.cmpi slt, %12, %13 : vector<128x1xi32>
    %cst_7 = arith.constant 0.000000e+00 : f32
    %15 = vector.shape_cast %14 : vector<128x1xi1> to vector<128x1xi1>
    %16 = vector.broadcast %15 : vector<128x1xi1> to vector<128x128xi1>
    %17 = vector.broadcast %cst_7 : f32 to vector<128x128xf32>
    %18 = arith.select %16, %11, %17 : vector<128x128xi1>, vector<128x128xf32>
    %19 = arith.mulf %18, %18 : vector<128x128xf32>
    %cst_8 = arith.constant dense<0.000000e+00> : vector<128xf32>
    %20 = vector.multi_reduction <add>, %19, %cst_8 [0] : vector<128x128xf32> to vector<128xf32>
    %21 = vector.shape_cast %20 : vector<128xf32> to vector<1x128xf32>
    %cst_9 = arith.constant 1.562500e-02 : f32
    %22 = vector.broadcast %cst_9 : f32 to vector<1x128xf32>
    %23 = arith.mulf %21, %22 : vector<1x128xf32>
    %cst_10 = arith.constant 9.99999974E-6 : f32
    %24 = vector.broadcast %cst_10 : f32 to vector<1x128xf32>
    %25 = arith.addf %23, %24 : vector<1x128xf32>
    %26 = math.rsqrt %25 : vector<1x128xf32>
    %27 = vector.broadcast %26 : vector<1x128xf32> to vector<128x128xf32>
    %28 = arith.mulf %11, %27 : vector<128x128xf32>
    %cst_11 = arith.constant 0.000000e+00 : f32
    %29 = vector.broadcast %cst_11 : f32 to vector<128x128xf32>
    %30 = arith.maximumf %28, %29 : vector<128x128xf32>
    %c0_12 = arith.constant 0 : index
    %c0_13 = arith.constant 0 : index
    %31 = vector.load %arg5[%c0_12, %c0_13] : memref<64x128xbf16, #tpu.memory_space<vmem>>, vector<64x128xbf16>
    %32 = arith.truncf %30 : vector<128x128xf32> to vector<128x128xbf16>
    %cst_14 = arith.constant dense<0.000000e+00> : vector<64x128xf32>
    %33 = tpu.matmul %31, %32, %cst_14 {dimension_numbers = #tpu.dot_dimension_numbers<[1], [0], [0], [1], [0, 0, 1, 1], [], []>} : vector<64x128xbf16>, vector<128x128xbf16>, vector<64x128xf32> -> vector<64x128xf32>
    %c0_15 = arith.constant 0 : index
    %c0_16 = arith.constant 0 : index
    %34 = vector.load %arg6[%c0_15, %c0_16] : memref<64x1xf32, #tpu.memory_space<vmem>>, vector<64x1xf32>
    %35 = vector.broadcast %34 : vector<64x1xf32> to vector<64x128xf32>
    %36 = arith.addf %33, %35 : vector<64x128xf32>
    %cst_17 = arith.constant dense<0.000000e+00> : vector<128xf32>
    %37 = vector.multi_reduction <add>, %36, %cst_17 [0] : vector<64x128xf32> to vector<128xf32>
    %38 = vector.shape_cast %37 : vector<128xf32> to vector<1x128xf32>
    %cst_18 = arith.constant 1.562500e-02 : f32
    %39 = vector.broadcast %cst_18 : f32 to vector<1x128xf32>
    %40 = arith.mulf %38, %39 : vector<1x128xf32>
    %41 = vector.broadcast %40 : vector<1x128xf32> to vector<64x128xf32>
    %42 = arith.subf %36, %41 : vector<64x128xf32>
    %43 = arith.mulf %42, %42 : vector<64x128xf32>
    %cst_19 = arith.constant dense<0.000000e+00> : vector<128xf32>
    %44 = vector.multi_reduction <add>, %43, %cst_19 [0] : vector<64x128xf32> to vector<128xf32>
    %45 = vector.shape_cast %44 : vector<128xf32> to vector<1x128xf32>
    %cst_20 = arith.constant 1.562500e-02 : f32
    %46 = vector.broadcast %cst_20 : f32 to vector<1x128xf32>
    %47 = arith.mulf %45, %46 : vector<1x128xf32>
    %cst_21 = arith.constant 9.99999974E-6 : f32
    %48 = vector.broadcast %cst_21 : f32 to vector<1x128xf32>
    %49 = arith.addf %47, %48 : vector<1x128xf32>
    %50 = math.rsqrt %49 : vector<1x128xf32>
    %51 = vector.broadcast %50 : vector<1x128xf32> to vector<64x128xf32>
    %52 = arith.mulf %42, %51 : vector<64x128xf32>
    %c0_22 = arith.constant 0 : index
    %c0_23 = arith.constant 0 : index
    %53 = vector.load %arg7[%c0_22, %c0_23] : memref<64x128xbf16, #tpu.memory_space<vmem>>, vector<64x128xbf16>
    %c0_24 = arith.constant 0 : index
    %c0_25 = arith.constant 0 : index
    %54 = vector.load %arg2[%c0_24, %c0_25] : memref<128x128xbf16, #tpu.memory_space<vmem>>, vector<128x128xbf16>
    %cst_26 = arith.constant dense<0.000000e+00> : vector<64x128xf32>
    %55 = tpu.matmul %53, %54, %cst_26 {dimension_numbers = #tpu.dot_dimension_numbers<[1], [0], [0], [1], [0, 0, 1, 1], [], []>} : vector<64x128xbf16>, vector<128x128xbf16>, vector<64x128xf32> -> vector<64x128xf32>
    %c0_27 = arith.constant 0 : index
    %c0_28 = arith.constant 0 : index
    %56 = vector.load %arg8[%c0_27, %c0_28] : memref<64x1xf32, #tpu.memory_space<vmem>>, vector<64x1xf32>
    %57 = vector.broadcast %56 : vector<64x1xf32> to vector<64x128xf32>
    %58 = arith.addf %55, %57 : vector<64x128xf32>
    %cst_29 = arith.constant 0.000000e+00 : f32
    %59 = vector.broadcast %cst_29 : f32 to vector<64x128xf32>
    %60 = arith.maximumf %58, %59 : vector<64x128xf32>
    %61 = arith.addf %52, %60 : vector<64x128xf32>
    %cst_30 = arith.constant 0.000000e+00 : f32
    %62 = vector.broadcast %cst_30 : f32 to vector<64x128xf32>
    %63 = arith.maximumf %61, %62 : vector<64x128xf32>
    %c0_31 = arith.constant 0 : index
    %c0_32 = arith.constant 0 : index
    %64 = vector.load %arg9[%c0_31, %c0_32] : memref<64x1xf32, #tpu.memory_space<vmem>>, vector<64x1xf32>
    %65 = vector.broadcast %64 : vector<64x1xf32> to vector<64x128xf32>
    %66 = arith.mulf %63, %65 : vector<64x128xf32>
    %cst_33 = arith.constant dense<0.000000e+00> : vector<128xf32>
    %67 = vector.multi_reduction <add>, %66, %cst_33 [0] : vector<64x128xf32> to vector<128xf32>
    %68 = vector.shape_cast %67 : vector<128xf32> to vector<1x128xf32>
    %c0_34 = arith.constant 0 : index
    %69 = memref.load %arg10[%c0_34] : memref<1xf32, #tpu.memory_space<smem>>
    %70 = vector.broadcast %69 : f32 to vector<1x128xf32>
    %71 = arith.addf %68, %70 : vector<1x128xf32>
    %c0_35 = arith.constant 0 : index
    %c0_36 = arith.constant 0 : index
    %72 = vector.load %arg11[%c0_35, %c0_36] : memref<1x128xf32, #tpu.memory_space<vmem>>, vector<1x128xf32>
    tpu.vector_store %arg11[%c0_35, %c0_36], %71 {strides = array<i32>} : memref<1x128xf32, #tpu.memory_space<vmem>>, vector<1x128xf32>,
    return
  }
  func.func @transform_0(%arg0: i32) -> (i32, i32) {
    %c0_i32 = arith.constant 0 : i32
    %c0_i32_0 = arith.constant 0 : i32
    return %c0_i32, %arg0 : i32, i32
  }
  func.func @transform_1(%arg0: i32) -> (i32, i32) {
    %c0_i32 = arith.constant 0 : i32
    %c0_i32_0 = arith.constant 0 : i32
    return %c0_i32, %arg0 : i32, i32
  }
  func.func @transform_2(%arg0: i32) -> (i32, i32) {
    %c0_i32 = arith.constant 0 : i32
    %c0_i32_0 = arith.constant 0 : i32
    %c0_i32_1 = arith.constant 0 : i32
    return %c0_i32, %c0_i32_0 : i32, i32
  }
  func.func @transform_3(%arg0: i32) -> (i32, i32) {
    %c0_i32 = arith.constant 0 : i32
    %c0_i32_0 = arith.constant 0 : i32
    %c0_i32_1 = arith.constant 0 : i32
    return %c0_i32, %c0_i32_0 : i32, i32
  }
  func.func @transform_4(%arg0: i32) -> (i32, i32) {
    %c0_i32 = arith.constant 0 : i32
    %c0_i32_0 = arith.constant 0 : i32
    %c0_i32_1 = arith.constant 0 : i32
    return %c0_i32, %c0_i32_0 : i32, i32
  }
  func.func @transform_5(%arg0: i32) -> (i32, i32) {
    %c0_i32 = arith.constant 0 : i32
    %c0_i32_0 = arith.constant 0 : i32
    %c0_i32_1 = arith.constant 0 : i32
    return %c0_i32, %c0_i32_0 : i32, i32
  }
  func.func @transform_6(%arg0: i32) -> (i32, i32) {
    %c0_i32 = arith.constant 0 : i32
    %c0_i32_0 = arith.constant 0 : i32
    %c0_i32_1 = arith.constant 0 : i32
    return %c0_i32, %c0_i32_0 : i32, i32
  }
  func.func @transform_7(%arg0: i32) -> (i32, i32) {
    %c0_i32 = arith.constant 0 : i32
    %c0_i32_0 = arith.constant 0 : i32
    %c0_i32_1 = arith.constant 0 : i32
    return %c0_i32, %c0_i32_0 : i32, i32
  }
  func.func @transform_8(%arg0: i32) -> (i32, i32) {
    %c0_i32 = arith.constant 0 : i32
    %c0_i32_0 = arith.constant 0 : i32
    %c0_i32_1 = arith.constant 0 : i32
    return %c0_i32, %c0_i32_0 : i32, i32
  }
  func.func @transform_9(%arg0: i32) -> i32 {
    %c0_i32 = arith.constant 0 : i32
    %c0_i32_0 = arith.constant 0 : i32
    return %c0_i32 : i32
  }
  func.func @transform_10(%arg0: i32) -> (i32, i32) {
    %c0_i32 = arith.constant 0 : i32
    %c0_i32_0 = arith.constant 0 : i32
    return %c0_i32, %arg0 : i32, i32
  }
}

</mosaic_0001>

<bundles_post_ra>
// kernel: _lambda_.1
= control target key start
LH: loop header
LB: loop body
LE: loop exit
PB: predicated region body
PF: predicated region fallthrough
CT: control target
= control target key end

     0   :  { %16 = vsyncpa [#allocation4], 0  ;;  %s1657_s0 = inlined_call_operand.vmem [shape: bf16[128,128], index: 0, kind: input, shape index: {}]   ;;  %s1658_s1 = inlined_call_operand.vmem [shape: bf16[128,128], index: 1, kind: input, shape index: {}]   ;;  %s1659_s2 = inlined_call_operand.hbm [shape: bf16[128,128], index: 2, kind: input, shape index: {}]   ;;  %s1660_s3 = inlined_call_operand.vmem [shape: f32[128,1], index: 3, kind: input, shape index: {}]   ;;  %s1661_s4 = inlined_call_operand.hbm [shape: bf16[64,128], index: 4, kind: input, shape index: {}]   ;;  %s1662_s5 = inlined_call_operand.hbm [shape: f32[64,1], index: 5, kind: input, shape index: {}]   ;;  %s1663_s6 = inlined_call_operand.vmem [shape: bf16[64,128], index: 6, kind: input, shape index: {}]   ;;  %s1664_s7 = inlined_call_operand.hbm [shape: f32[64,1], index: 7, kind: input, shape index: {}]   ;;  %s1665_s8 = inlined_call_operand.hbm [shape: f32[64,1], index: 8, kind: input, shape index: {}]   ;;  %s1666_s9 = inlined_call_operand.<no memory space> [shape: f32[1], index: 9, kind: input, shape index: {}]   ;;  %s1667_s10 = inlined_call_operand.vmem [shape: f32[1,128], index: 10, kind: output, shape index: {}]  }
   0x1   :  { %17 = vsyncpa [#allocation6], 0 }
   0x2   :  { %18 = vsyncpa [#allocation9], 0  ;;  %s42_s15 = sshll.u32 %s1661_s4, 4  ;;  %s1355_s16 = smov [#allocation5]   ;;  %s43_s15 = int_to_ptr.hbm [resolvable:$true] %s42_s15 }
   0x3   :  { %s44_s17 = sshll.u32 %s1355_s16, 4  ;;  %s1356_s18 = smov 64   ;;  %s45_s17 = int_to_ptr.vmem [resolvable:$true] %s44_s17 }
   0x4   :  { %s1357_s19 = smov 4   ;;  %s70_s22 = sshll.u32 %s1664_s7, 4  ;;  %s71_s22 = int_to_ptr.hbm [resolvable:$true] %s70_s22 }
   0x5   :  { %50 = dma.hbm_to_vmem [thread:$0]  %s43_s15, 512, %s45_s17, [#allocation6], %s1356_s18, %s1356_s18, %s1357_s19  }
   0x6   :  { %s1358_s23 = smov [#allocation8]   ;;  %s27_s27 = sshll.u32 %s1659_s2, 4  ;;  %s28_s27 = int_to_ptr.hbm [resolvable:$true] %s27_s27 }
   0x7   :  { %s72_s24 = sshll.u32 %s1358_s23, 4  ;;  %s1359_s4 = smov 128   ;;  %s73_s24 = int_to_ptr.vmem [resolvable:$true] %s72_s24 }
   0x8   :  { %s1360_s28 = smov 8   ;;  %s55_s11 = sshll.u32 %s1662_s5, 4  ;;  %s56_s11 = int_to_ptr.hbm [resolvable:$true] %s55_s11 }
   0x9   :  { %78 = dma.hbm_to_vmem [thread:$0]  %s71_s22, 1024, %s73_s24, [#allocation9], %s1359_s4, %s1359_s4, %s1360_s28  }
   0xa   :  { %s1361_s12 = smov [#allocation3]   ;;  %s1362_s7 = smov [#allocation7]  }
   0xb   :  { %s29_s13 = sshll.u32 %s1361_s12, 4  ;;  %s57_s14 = sshll.u32 %s1362_s7, 4  ;;  %s30_s13 = int_to_ptr.vmem [resolvable:$true] %s29_s13  ;;  %s58_s14 = int_to_ptr.vmem [resolvable:$true] %s57_s14 }
   0xc   :  { %35 = dma.hbm_to_vmem [thread:$0]  %s28_s27, 1024, %s30_s13, [#allocation4], %s1356_s18, %s1356_s18, %s1357_s19  }
   0xd   :  { %s83_s2 = sshll.u32 %s1665_s8, 4  ;;  %s1363_s17 = smov [#allocation10]   ;;  %s84_s2 = int_to_ptr.hbm [resolvable:$true] %s83_s2 }
   0xe   :  { %63 = dma.hbm_to_vmem [thread:$0]  %s56_s11, 1024, %s58_s14, [#allocation6], %s1359_s4, %s1359_s4, %s1360_s28  }
   0xf   :  { %s85_s20 = sshll.u32 %s1363_s17, 4  ;;  %s86_s20 = int_to_ptr.vmem [resolvable:$true] %s85_s20 }
  0x10   :  { %91 = dma.hbm_to_vmem [thread:$0]  %s84_s2, 1024, %s86_s20, [#allocation9], %s1359_s4, %s1359_s4, %s1360_s28  }
  0x11   :  { %1349 = dma.done.wait [#allocation4], 1024  }
  0x12   :  { %1350 = vsyncadd [#allocation4], 4294966272 }
  0x13   :  { %1351 = dma.done.wait [#allocation6], 1536  }
  0x14   :  { %1352 = vsyncadd [#allocation6], 4294965760 }
  0x15   :  { %1353 = dma.done.wait [#allocation9], 2048  }
  0x16   :  { %1354 = vsyncadd [#allocation9], 4294965248  ;;  %v1364_v0 = vmov 0   ;;  %v148_v1 = vld [vmem:[%s1660_s3 + $0x10] sm:$0xff]  ;;  %v146_v2 = vld [vmem:[%s1660_s3] sm:$0xff] }
  0x17   :  { %1223 = vset.pattern.permute.xlu1 %v1364_v0  ;;  %1222 = vset.pattern.permute.xlu0 %v1364_v0  ;;  %v1187_v3 = vld [vmem:[%s1657_s0 + $0x38] sm:$0xff]  ;;  %v1186_v5 = vld [vmem:[%s1657_s0 + $0x30] sm:$0xff]  ;;  %v150_v7 = vld [vmem:[%s1660_s3 + $0x20] sm:$0xff] }
  0x18   :  { %1224 = vset.pattern.permute.xlu2 %v1364_v0  ;;  %174 = vperm.xlu1 %1223, %v148_v1   ;;  %v1203_v4 = vld [vmem:[%s1658_s1 + $0x38] sm:$0xff]  ;;  %v1202_v6 = vld [vmem:[%s1658_s1 + $0x30] sm:$0xff]  ;;  %v147_v9 = vld [vmem:[%s1660_s3 + $0x8] sm:$0xff] }
  0x19   :  { %164 = vperm.xlu0 %1222, %v146_v2   ;;  %338 = vmatpush.bf16.msra.mxu0 %v1187_v3  ;;  %v149_v8 = vld [vmem:[%s1660_s3 + $0x18] sm:$0xff]  ;;  %v1185_v10 = vld [vmem:[%s1657_s0 + $0x28] sm:$0xff]  ;;  %v1184_v13 = vld [vmem:[%s1657_s0 + $0x20] sm:$0xff] }
  0x1a   :  { %1204 = vmatpush.bf16.msra.mxu3 %v1187_v3  ;;  %911 = vmatpush.bf16.msra.mxu2 %v1203_v4  ;;  %v1201_v11 = vld [vmem:[%s1658_s1 + $0x28] sm:$0xff]  ;;  %v1200_v14 = vld [vmem:[%s1658_s1 + $0x20] sm:$0xff]  ;;  %v153_v15 = vld [vmem:[%s1660_s3 + $0x38] sm:$0xff] }
  0x1b   :  { %184 = vperm.xlu2 %1224, %v150_v7   ;;  %v151_v12 = vld [vmem:[%s1660_s3 + $0x28] sm:$0xff]  ;;  %v152_v16 = vld [vmem:[%s1660_s3 + $0x30] sm:$0xff]  ;;  %v1183_v17 = vld [vmem:[%s1657_s0 + $0x18] sm:$0xff] }
  0x1c   :  { %v1199_v18 = vld [vmem:[%s1658_s1 + $0x18] sm:$0xff]  ;;  %v154_v19 = vld [vmem:[%s1660_s3 + $0x40] sm:$0xff]  ;;  %v1182_v20 = vld [vmem:[%s1657_s0 + $0x10] sm:$0xff] }
  0x1d   :  { %339 = vmatpush.bf16.msra.mxu0 %v1186_v5  ;;  %v1198_v21 = vld [vmem:[%s1658_s1 + $0x10] sm:$0xff]  ;;  %v155_v23 = vld [vmem:[%s1660_s3 + $0x48] sm:$0xff]  ;;  %v157_v26 = vld [vmem:[%s1660_s3 + $0x58] sm:$0xff] }
  0x1e   :  { %1205 = vmatpush.bf16.msra.mxu3 %v1186_v5  ;;  %912 = vmatpush.bf16.msra.mxu2 %v1202_v6  ;;  %v156_v22 = vld [vmem:[%s1660_s3 + $0x50] sm:$0xff]  ;;  %v1181_v24 = vld [vmem:[%s1657_s0 + $0x8] sm:$0xff]  ;;  %v1180_v27 = vld [vmem:[%s1657_s0] sm:$0xff] }
  0x1f   :  { %v1197_v25 = vld [vmem:[%s1658_s1 + $0x8] sm:$0xff]  ;;  %v1196_v28 = vld [vmem:[%s1658_s1] sm:$0xff]  ;;  %v160_v34 = vld [vmem:[%s1660_s3 + $0x70] sm:$0xff] }
  0x20   :  { %179 = vperm.xlu1 %1223, %v149_v8   ;;  %v159_v29 = vld [vmem:[%s1660_s3 + $0x68] sm:$0xff]  ;;  %v158_v30 = vld [vmem:[%s1660_s3 + $0x60] sm:$0xff]  ;;  %v161_v36 = vld [vmem:[%s1660_s3 + $0x78] sm:$0xff] }
  0x21   :  { %169 = vperm.xlu0 %1222, %v147_v9   ;;  %340 = vmatpush.bf16.msra.mxu0 %v1185_v10  ;;  %v1172_v31 = vld [vmem:[#allocation3] sm:$0xff]  ;;  %v604_v37 = vld [vmem:[#allocation7 + $0x8] sm:$0xff]  ;;  %v606_v38 = vld [vmem:[#allocation7 + $0x18] sm:$0xff] }
  0x22   :  { %1206 = vmatpush.bf16.msra.mxu3 %v1185_v10  ;;  %913 = vmatpush.bf16.msra.mxu2 %v1201_v11  ;;  %v1176_v32 = vld [vmem:[#allocation3 + $0x20] sm:$0xff]  ;;  %v605_v39 = vld [vmem:[#allocation7 + $0x10] sm:$0xff]  ;;  %v1173_v40 = vld [vmem:[#allocation3 + $0x8] sm:$0xff] }
  0x23   :  { %189 = vperm.xlu2 %1224, %v151_v12   ;;  %v1192_v33 = vld [vmem:[%s1663_s6] sm:$0xff]  ;;  %v1177_v41 = vld [vmem:[#allocation3 + $0x28] sm:$0xff]  ;;  %v609_v44 = vld [vmem:[#allocation7 + $0x30] sm:$0xff] }
  0x24   :  { %v603_v35 = vld [vmem:[#allocation7] sm:$0xff]  ;;  %v1193_v42 = vld [vmem:[%s1663_s6 + $0x8] sm:$0xff]  ;;  %v610_v46 = vld [vmem:[#allocation7 + $0x38] sm:$0xff] }
  0x25   :  { %341 = vmatpush.bf16.msra.mxu0 %v1184_v13  ;;  %v607_v43 = vld [vmem:[#allocation7 + $0x20] sm:$0xff]  ;;  %v608_v45 = vld [vmem:[#allocation7 + $0x28] sm:$0xff]  ;;  %v1174_v49 = vld [vmem:[#allocation3 + $0x10] sm:$0xff] }
  0x26   :  { %1207 = vmatpush.bf16.msra.mxu3 %v1184_v13  ;;  %914 = vmatpush.bf16.msra.mxu2 %v1200_v14  ;;  %v792_v47 = vld [vmem:[#allocation8 + $0x8] sm:$0xff]  ;;  %v791_v48 = vld [vmem:[#allocation8] sm:$0xff]  ;;  %v1178_v50 = vld [vmem:[#allocation3 + $0x30] sm:$0xff] }
  0x27   :  { %v1194_v51 = vld [vmem:[%s1663_s6 + $0x10] sm:$0xff]  ;;  %v795_v53 = vld [vmem:[#allocation8 + $0x20] sm:$0xff]  ;;  %v794_v54 = vld [vmem:[#allocation8 + $0x18] sm:$0xff] }
  0x28   :  { %199 = vperm.xlu1 %1223, %v153_v15   ;;  %v793_v52 = vld [vmem:[#allocation8 + $0x10] sm:$0xff]  ;;  %v796_v55 = vld [vmem:[#allocation8 + $0x28] sm:$0xff]  ;;  %v964_v57 = vld [vmem:[#allocation10] sm:$0xff] }
  0x29   :  { %194 = vperm.xlu0 %1222, %v152_v16   ;;  %342 = vmatpush.bf16.msra.mxu0 %v1183_v17  ;;  %v965_v56 = vld [vmem:[#allocation10 + $0x8] sm:$0xff]  ;;  %v1175_v58 = vld [vmem:[#allocation3 + $0x18] sm:$0xff]  ;;  %v797_v61 = vld [vmem:[#allocation8 + $0x30] sm:$0xff] }
  0x2a   :  { %1208 = vmatpush.bf16.msra.mxu3 %v1183_v17  ;;  %915 = vmatpush.bf16.msra.mxu2 %v1199_v18  ;;  %v1179_v59 = vld [vmem:[#allocation3 + $0x38] sm:$0xff]  ;;  %v966_v63 = vld [vmem:[#allocation10 + $0x10] sm:$0xff]  ;;  %v969_v1 = vld [vmem:[#allocation10 + $0x28] sm:$0xff] }
  0x2b   :  { %204 = vperm.xlu2 %1224, %v154_v19   ;;  %v1195_v60 = vld [vmem:[%s1663_s6 + $0x18] sm:$0xff]  ;;  %v968_v2 = vld [vmem:[#allocation10 + $0x20] sm:$0xff]  ;;  %v970_v3 = vld [vmem:[#allocation10 + $0x30] sm:$0xff] }
  0x2c   :  { %v798_v62 = vld [vmem:[#allocation8 + $0x38] sm:$0xff] }
  0x2d   :  { %343 = vmatpush.bf16.msra.mxu0 %v1182_v20  ;;  %v967_v0 = vld [vmem:[#allocation10 + $0x18] sm:$0xff] }
  0x2e   :  { %1209 = vmatpush.bf16.msra.mxu3 %v1182_v20  ;;  %916 = vmatpush.bf16.msra.mxu2 %v1198_v21  ;;  %v971_v4 = vld [vmem:[#allocation10 + $0x38] sm:$0xff] }
  0x30   :  { %214 = vperm.xlu1 %1223, %v156_v22  }
  0x31   :  { %209 = vperm.xlu0 %1222, %v155_v23   ;;  %344 = vmatpush.bf16.msra.mxu0 %v1181_v24 }
  0x32   :  { %1210 = vmatpush.bf16.msra.mxu3 %v1181_v24  ;;  %917 = vmatpush.bf16.msra.mxu2 %v1197_v25 }
  0x33   :  { %219 = vperm.xlu2 %1224, %v157_v26  }
  0x35   :  { %345 = vmatpush.bf16.msra.mxu0 %v1180_v27 }
  0x36   :  { %1211 = vmatpush.bf16.msra.mxu3 %v1180_v27  ;;  %918 = vmatpush.bf16.msra.mxu2 %v1196_v28 }
  0x38   :  { %229 = vperm.xlu1 %1223, %v159_v29   ;;  %346 = vmatmul.bf16.vlgmr.msra.gmra.mxu0 %v1172_v31 }
  0x39   :  { %224 = vperm.xlu0 %1222, %v158_v30   ;;  %366 = vmatmul.bf16.vlgmr.msra.gmra.mxu3 %v1176_v32 }
  0x3a   :  { %919 = vmatmul.bf16.vlgmr.msra.gmra.mxu2 %v1192_v33 }
  0x3b   :  { %234 = vperm.xlu2 %1224, %v160_v34  }
  0x40   :  { %613 = vperm.xlu1 %1223, %v603_v35  }
  0x41   :  { %239 = vperm.xlu0 %1222, %v161_v36  }
  0x43   :  { %618 = vperm.xlu2 %1224, %v604_v37  }
  0x48   :  { %628 = vperm.xlu1 %1223, %v606_v38   ;;  %351 = vmatmul.bf16.gmra.mxu0 %v1173_v40 }
  0x49   :  { %623 = vperm.xlu0 %1222, %v605_v39   ;;  %371 = vmatmul.bf16.gmra.mxu3 %v1177_v41 }
  0x4a   :  { %924 = vmatmul.bf16.gmra.mxu2 %v1193_v42 }
  0x4b   :  { %633 = vperm.xlu2 %1224, %v607_v43  }
  0x50   :  { %643 = vperm.xlu1 %1223, %v609_v44  }
  0x51   :  { %638 = vperm.xlu0 %1222, %v608_v45  }
  0x53   :  { %648 = vperm.xlu2 %1224, %v610_v46  }
  0x58   :  { %806 = vperm.xlu1 %1223, %v792_v47   ;;  %356 = vmatmul.bf16.gmra.mxu0 %v1174_v49 }
  0x59   :  { %801 = vperm.xlu0 %1222, %v791_v48   ;;  %376 = vmatmul.bf16.gmra.mxu3 %v1178_v50 }
  0x5a   :  { %929 = vmatmul.bf16.gmra.mxu2 %v1194_v51 }
  0x5b   :  { %811 = vperm.xlu2 %1224, %v793_v52  }
  0x60   :  { %821 = vperm.xlu1 %1223, %v795_v53  }
  0x61   :  { %816 = vperm.xlu0 %1222, %v794_v54  }
  0x63   :  { %826 = vperm.xlu2 %1224, %v796_v55  }
  0x68   :  { %979 = vperm.xlu1 %1223, %v965_v56   ;;  %361 = vmatmul.bf16.gmra.mxu0 %v1175_v58 }
  0x69   :  { %974 = vperm.xlu0 %1222, %v964_v57   ;;  %381 = vmatmul.bf16.gmra.mxu3 %v1179_v59 }
  0x6a   :  { %934 = vmatmul.bf16.gmra.mxu2 %v1195_v60 }
  0x6b   :  { %831 = vperm.xlu2 %1224, %v797_v61  }
  0x70   :  { %836 = vperm.xlu1 %1223, %v798_v62  }
  0x71   :  { %984 = vperm.xlu0 %1222, %v966_v63  }
  0x73   :  { %989 = vperm.xlu2 %1224, %v967_v0  }
  0x75   :  { %v185_v14 = vpop.permute.xlu2 %184 }
  0x78   :  { %999 = vperm.xlu1 %1223, %v969_v1  }
  0x79   :  { %994 = vperm.xlu0 %1222, %v968_v2  }
  0x7b   :  { %1004 = vperm.xlu2 %1224, %v970_v3  }
  0x7d   :  { %v190_v19 = vpop.permute.xlu2 %189 }
  0x81   :  { %1009 = vperm.xlu0 %1222, %v971_v4  }
  0x85   :  { %v205_v32 = vpop.permute.xlu2 %204 }
  0x8a   :  { %v175_v13 = vpop.permute.xlu1 %174 }
  0x8b   :  { %v165_v10 = vpop.permute.xlu0 %164 }
  0x8d   :  { %v220_v46 = vpop.permute.xlu2 %219 }
  0x92   :  { %v180_v18 = vpop.permute.xlu1 %179 }
  0x93   :  { %v170_v16 = vpop.permute.xlu0 %169 }
  0x95   :  { %v235_v60 = vpop.permute.xlu2 %234 }
  0x9a   :  { %v200_v28 = vpop.permute.xlu1 %199 }
  0x9b   :  { %v195_v22 = vpop.permute.xlu0 %194 }
  0xa2   :  { %v215_v43 = vpop.permute.xlu1 %214 }
  0xa3   :  { %v210_v36 = vpop.permute.xlu0 %209 }
  0xaa   :  { %v230_v57 = vpop.permute.xlu1 %229 }
  0xab   :  { %v225_v50 = vpop.permute.xlu0 %224 }
  0xb3   :  { %v240_v0 = vpop.permute.xlu0 %239 }
  0xb5   :  { %v347_v5 = vpop.f32.mrf.mxu0 }
  0xb6   :  { %v348_v24 = vadd.f32 %v347_v5, %v165_v10 }
  0xbc   :  { %v367_v6 = vpop.f32.mrf.mxu3 }
  0xbd   :  { %v349_v7 = vpop.f32.mrf.mxu0  ;;  %v1543_v44 = vadd.f32 %v367_v6, %v205_v32 }
  0xbe   :  { %v350_v23 = vadd.f32 %v349_v7, %v170_v16 }
  0xc0   :  { %v387_v26 = vadd.f32 %v350_v23, %v348_v24 }
  0xc4   :  { %v369_v8 = vpop.f32.mrf.mxu3 }
  0xc5   :  { %v352_v9 = vpop.f32.mrf.mxu0  ;;  %v1545_v48 = vadd.f32 %v369_v8, %v210_v36 }
  0xc6   :  { %v353_v25 = vadd.f32 %v352_v9, %v175_v13 }
  0xc8   :  { %v388_v30 = vadd.f32 %v387_v26, %v353_v25 }
  0xcc   :  { %v372_v11 = vpop.f32.mrf.mxu3 }
  0xcd   :  { %v354_v12 = vpop.f32.mrf.mxu0  ;;  %v1548_v51 = vadd.f32 %v372_v11, %v215_v43 }
  0xce   :  { %v355_v27 = vadd.f32 %v354_v12, %v180_v18 }
  0xd0   :  { %v389_v34 = vadd.f32 %v388_v30, %v355_v27 }
  0xd4   :  { %v374_v15 = vpop.f32.mrf.mxu3 }
  0xd5   :  { %v357_v17 = vpop.f32.mrf.mxu0  ;;  %v1551_v53 = vadd.f32 %v374_v15, %v220_v46 }
  0xd6   :  { %v358_v31 = vadd.f32 %v357_v17, %v185_v14 }
  0xd8   :  { %v390_v37 = vadd.f32 %v389_v34, %v358_v31 }
  0xdc   :  { %v377_v20 = vpop.f32.mrf.mxu3 }
  0xdd   :  { %v359_v21 = vpop.f32.mrf.mxu0  ;;  %v1554_v55 = vadd.f32 %v377_v20, %v225_v50 }
  0xde   :  { %v360_v35 = vadd.f32 %v359_v21, %v190_v19 }
  0xe0   :  { %v391_v39 = vadd.f32 %v390_v37, %v360_v35 }
  0xe4   :  { %v379_v33 = vpop.f32.mrf.mxu3 }
  0xe5   :  { %v362_v29 = vpop.f32.mrf.mxu0  ;;  %v1557_v58 = vadd.f32 %v379_v33, %v230_v57 }
  0xe6   :  { %v363_v38 = vadd.f32 %v362_v29, %v195_v22 }
  0xe8   :  { %v392_v41 = vadd.f32 %v391_v39, %v363_v38 }
  0xec   :  { %v382_v47 = vpop.f32.mrf.mxu3 }
  0xed   :  { %v364_v40 = vpop.f32.mrf.mxu0  ;;  %v1560_v62 = vadd.f32 %v382_v47, %v235_v60 }
  0xee   :  { %v365_v42 = vadd.f32 %v364_v40, %v200_v28 }
  0xf0   :  { %v393_v45 = vadd.f32 %v392_v41, %v365_v42 }
  0xf2   :  { %v394_v49 = vadd.f32 %v393_v45, %v1543_v44 }
  0xf4   :  { %v395_v52 = vadd.f32 %v394_v49, %v1545_v48  ;;  %v384_v61 = vpop.f32.mrf.mxu3 }
  0xf5   :  { %v385_v1 = vadd.f32 %v384_v61, %v240_v0 }
  0xf6   :  { %v396_v54 = vadd.f32 %v395_v52, %v1548_v51 }
  0xf8   :  { %v397_v56 = vadd.f32 %v396_v54, %v1551_v53 }
  0xfa   :  { %v398_v59 = vadd.f32 %v397_v56, %v1554_v55 }
  0xfc   :  { %v399_v63 = vadd.f32 %v398_v59, %v1557_v58 }
  0xfe   :  { %v400_v2 = vadd.f32 %v399_v63, %v1560_v62 }
 0x100   :  { %v401_v3 = vadd.f32 %v400_v2, %v385_v1 }
 0x102   :  { %v402_v4 = vrot.slane %v401_v3, 4 }
 0x104   :  { %v403_v5 = vadd.f32 %v402_v4, %v401_v3 }
 0x106   :  { %v404_v6 = vrot.slane %v403_v5, 2 }
 0x108   :  { %v405_v7 = vadd.f32 %v404_v6, %v403_v5 }
 0x10a   :  { %v406_v8 = vrot.slane %v405_v7, 1 }
 0x10c   :  { %v407_v9 = vadd.f32 %v406_v8, %v405_v7 }
 0x10e   :  { %v408_v10 = vmul.f32 0.015625, %v407_v9 }
 0x110   :  { %v1564_v11 = vsub.f32 %v348_v24, %v408_v10  ;;  %v1566_v12 = vsub.f32 %v350_v23, %v408_v10  ;;  %v1568_v13 = vsub.f32 %v353_v25, %v408_v10  ;;  %v1570_v14 = vsub.f32 %v355_v27, %v408_v10 }
 0x111   :  { %v1576_v17 = vsub.f32 %v358_v31, %v408_v10  ;;  %v1580_v20 = vsub.f32 %v360_v35, %v408_v10  ;;  %v1584_v23 = vsub.f32 %v363_v38, %v408_v10  ;;  %v1588_v26 = vsub.f32 %v365_v42, %v408_v10 }
 0x112   :  { %v506_v15 = vmul.f32 %v1564_v11, %v1564_v11  ;;  %v507_v16 = vmul.f32 %v1566_v12, %v1566_v12  ;;  %v508_v18 = vmul.f32 %v1568_v13, %v1568_v13  ;;  %v509_v21 = vmul.f32 %v1570_v14, %v1570_v14 }
 0x113   :  { %v510_v24 = vmul.f32 %v1576_v17, %v1576_v17  ;;  %v511_v27 = vmul.f32 %v1580_v20, %v1580_v20  ;;  %v512_v29 = vmul.f32 %v1584_v23, %v1584_v23  ;;  %v513_v31 = vmul.f32 %v1588_v26, %v1588_v26 }
 0x114   :  { %v522_v19 = vadd.f32 %v507_v16, %v506_v15  ;;  %v424_v49 = vsub.f32 %v385_v1, %v408_v10  ;;  %v423_v52 = vsub.f32 %v1560_v62, %v408_v10  ;;  %v421_v54 = vsub.f32 %v1554_v55, %v408_v10 }
 0x115   :  { %v422_v56 = vsub.f32 %v1557_v58, %v408_v10  ;;  %v419_v57 = vsub.f32 %v1548_v51, %v408_v10  ;;  %v420_v60 = vsub.f32 %v1551_v53, %v408_v10  ;;  %v417_v61 = vsub.f32 %v1543_v44, %v408_v10 }
 0x116   :  { %v523_v22 = vadd.f32 %v522_v19, %v508_v18  ;;  %v418_v63 = vsub.f32 %v1545_v48, %v408_v10 }
 0x118   :  { %v524_v25 = vadd.f32 %v523_v22, %v509_v21 }
 0x11a   :  { %v525_v28 = vadd.f32 %v524_v25, %v510_v24 }
 0x11c   :  { %v526_v30 = vadd.f32 %v525_v28, %v511_v27 }
 0x11e   :  { %v527_v32 = vadd.f32 %v526_v30, %v512_v29 }
 0x120   :  { %v528_v33 = vadd.f32 %v527_v32, %v513_v31 }
 0x122   :  { %v537_v34 = vrot.slane %v528_v33, 4 }
 0x124   :  { %v538_v35 = vadd.f32 %v537_v34, %v528_v33 }
 0x126   :  { %v539_v36 = vrot.slane %v538_v35, 2 }
 0x128   :  { %v540_v37 = vadd.f32 %v539_v36, %v538_v35 }
 0x12a   :  { %v541_v38 = vrot.slane %v540_v37, 1 }
 0x12c   :  { %v542_v39 = vadd.f32 %v541_v38, %v540_v37  ;;  %v1188_v37 = vld [vmem:[#allocation5] sm:$0xff]  ;;  %v1191_v38 = vld [vmem:[#allocation5 + $0x18] sm:$0xff] }
 0x12e   :  { %v543_v40 = vmul.f32 0.015625, %v542_v39 }
 0x130   :  { %v544_v41 = vadd.f32 1e-05, %v543_v40 }
 0x132   :  { %1225 = vrsqrt.f32 %v544_v41  ;;  %vm551_vm1 = vweird.f32 %v544_v41 }
 0x138   :  { %v1226_v42 = vpop.eup %1225 }
 0x139   :  { %v546_v43 = vmul.f32 %v1226_v42, %v544_v41  ;;  %vm552_vm0 = vweird.f32 %v1226_v42  ;;  %v614_v41 = vpop.permute.xlu1 %613 }
 0x13a   :  { %vm553_vm2 = vmor %vm551_vm1, %vm552_vm0 }
 0x13b   :  { %v547_v45 = vmul.f32 %v1226_v42, %v546_v43  ;;  %v619_v43 = vpop.permute.xlu2 %618 }
 0x13d   :  { %v548_v46 = vmul.f32 0.5, %v547_v45  ;;  %v624_v45 = vpop.permute.xlu0 %623 }
 0x13f   :  { %v549_v47 = vsub.f32 1.5, %v548_v46 }
 0x141   :  { %v550_v50 = vmul.f32 %v1226_v42, %v549_v47  ;;  %v629_v47 = vpop.permute.xlu1 %628 }
 0x143   :  { %v554_v59 = vsel %vm553_vm2, %v1226_v42, %v550_v50 }
 0x144   :  { %v569_v0 = vmul.f32 %v554_v59, %v423_v52  ;;  %v570_v1 = vmul.f32 %v554_v59, %v424_v49  ;;  %v567_v2 = vmul.f32 %v554_v59, %v421_v54  ;;  %v568_v3 = vmul.f32 %v554_v59, %v422_v56  ;;  %v634_v54 = vpop.permute.xlu2 %633 }
 0x145   :  { %v565_v4 = vmul.f32 %v554_v59, %v419_v57  ;;  %v566_v62 = vmul.f32 %v554_v59, %v420_v60  ;;  %v563_v5 = vmul.f32 %v554_v59, %v417_v61  ;;  %v564_v6 = vmul.f32 %v554_v59, %v418_v63  ;;  %v639_v63 = vpop.permute.xlu0 %638 }
 0x146   :  { %v585_v55 = vmax.f32 %v569_v0, 0.0  ;;  %v586_v7 = vmax.f32 %v570_v1, 0.0  ;;  %v583_v58 = vmax.f32 %v567_v2, 0.0  ;;  %v584_v8 = vmax.f32 %v568_v3, 0.0 }
 0x147   :  { %v581_v51 = vmax.f32 %v565_v4, 0.0  ;;  %v582_v9 = vmax.f32 %v566_v62, 0.0  ;;  %v579_v15 = vmax.f32 %v563_v5, 0.0  ;;  %v580_v53 = vmax.f32 %v564_v6, 0.0 }
 0x148   :  { %v602_v16 = vpack.c.bf16 %v586_v7, %v585_v55  ;;  %v601_v44 = vpack.c.bf16 %v584_v8, %v583_v58  ;;  %v557_v10 = vmul.f32 %v554_v59, %v1568_v13  ;;  %v558_v19 = vmul.f32 %v554_v59, %v1570_v14  ;;  %v920_v55 = vpop.f32.mrf.mxu2 }
 0x149   :  { %v600_v18 = vpack.c.bf16 %v582_v9, %v581_v51  ;;  %v599_v48 = vpack.c.bf16 %v580_v53, %v579_v15  ;;  %v555_v21 = vmul.f32 %v554_v59, %v1564_v11  ;;  %v556_v22 = vmul.f32 %v554_v59, %v1566_v12  ;;  %v644_v2 = vpop.permute.xlu1 %643 }
 0x14a   :  { %675 = vmatpush.bf16.msra.mxu1 %v602_v16  ;;  %v573_v24 = vmax.f32 %v557_v10, 0.0  ;;  %v574_v25 = vmax.f32 %v558_v19, 0.0  ;;  %v561_v31 = vmul.f32 %v554_v59, %v1584_v23  ;;  %v562_v32 = vmul.f32 %v554_v59, %v1588_v26  ;;  %v1189_v23 = vld [vmem:[#allocation5 + $0x8] sm:$0xff]  ;;  %v1190_v26 = vld [vmem:[#allocation5 + $0x10] sm:$0xff] }
 0x14b   :  { %v571_v27 = vmax.f32 %v555_v21, 0.0  ;;  %v572_v28 = vmax.f32 %v556_v22, 0.0  ;;  %v559_v14 = vmul.f32 %v554_v59, %v1576_v17  ;;  %v560_v11 = vmul.f32 %v554_v59, %v1580_v20 }
 0x14c   :  { %v596_v29 = vpack.c.bf16 %v574_v25, %v573_v24  ;;  %v577_v33 = vmax.f32 %v561_v31, 0.0  ;;  %v578_v13 = vmax.f32 %v562_v32, 0.0  ;;  %v649_v5 = vpop.permute.xlu2 %648 }
 0x14d   :  { %v595_v30 = vpack.c.bf16 %v572_v28, %v571_v27  ;;  %v575_v34 = vmax.f32 %v559_v14, 0.0  ;;  %v576_v35 = vmax.f32 %v560_v11, 0.0 }
 0x14e   :  { %676 = vmatpush.bf16.msra.mxu1 %v601_v44  ;;  %v598_v12 = vpack.c.bf16 %v578_v13, %v577_v33 }
 0x14f   :  { %v597_v36 = vpack.c.bf16 %v576_v35, %v575_v34 }
 0x150   :  { %v922_v53 = vpop.f32.mrf.mxu2 }
 0x152   :  { %677 = vmatpush.bf16.msra.mxu1 %v600_v18 }
 0x156   :  { %678 = vmatpush.bf16.msra.mxu1 %v599_v48 }
 0x158   :  { %v925_v22 = vpop.f32.mrf.mxu2 }
 0x15a   :  { %679 = vmatpush.bf16.msra.mxu1 %v598_v12 }
 0x15e   :  { %680 = vmatpush.bf16.msra.mxu1 %v597_v36 }
 0x160   :  { %v927_v36 = vpop.f32.mrf.mxu2 }
 0x162   :  { %681 = vmatpush.bf16.msra.mxu1 %v596_v29 }
 0x166   :  { %682 = vmatpush.bf16.msra.mxu1 %v595_v30 }
 0x169   :  { %683 = vmatmul.bf16.vlgmr.msra.gmra.mxu1 %v1188_v37 }
 0x179   :  { %688 = vmatmul.bf16.gmra.mxu1 %v1189_v23 }
 0x189   :  { %693 = vmatmul.bf16.gmra.mxu1 %v1190_v26 }
 0x199   :  { %698 = vmatmul.bf16.gmra.mxu1 %v1191_v38 }
 0x1e6   :  { %v684_v17 = vpop.f32.mrf.mxu1 }
 0x1e7   :  { %v685_v50 = vadd.f32 %v684_v17, %v614_v41  ;;  %v930_v41 = vpop.f32.mrf.mxu2 }
 0x1ee   :  { %v686_v39 = vpop.f32.mrf.mxu1 }
 0x1ef   :  { %v687_v49 = vadd.f32 %v686_v39, %v619_v43  ;;  %v807_v43 = vpop.permute.xlu1 %806 }
 0x1f1   :  { %v704_v56 = vadd.f32 %v687_v49, %v685_v50 }
 0x1f6   :  { %v689_v20 = vpop.f32.mrf.mxu1 }
 0x1f7   :  { %v690_v52 = vadd.f32 %v689_v20, %v624_v45  ;;  %v802_v20 = vpop.permute.xlu0 %801 }
 0x1f9   :  { %v705_v60 = vadd.f32 %v704_v56, %v690_v52 }
 0x1fe   :  { %v691_v40 = vpop.f32.mrf.mxu1 }
 0x1ff   :  { %v692_v57 = vadd.f32 %v691_v40, %v629_v47  ;;  %v812_v47 = vpop.permute.xlu2 %811 }
 0x201   :  { %v706_v0 = vadd.f32 %v705_v60, %v692_v57 }
 0x206   :  { %v694_v42 = vpop.f32.mrf.mxu1 }
 0x207   :  { %v695_v61 = vadd.f32 %v694_v42, %v634_v54  ;;  %v932_v54 = vpop.f32.mrf.mxu2 }
 0x209   :  { %v707_v3 = vadd.f32 %v706_v0, %v695_v61 }
 0x20e   :  { %v696_v46 = vpop.f32.mrf.mxu1 }
 0x20f   :  { %v697_v1 = vadd.f32 %v696_v46, %v639_v63  ;;  %v935_v0 = vpop.f32.mrf.mxu2 }
 0x211   :  { %v708_v62 = vadd.f32 %v707_v3, %v697_v1 }
 0x216   :  { %v699_v59 = vpop.f32.mrf.mxu1 }
 0x217   :  { %v700_v4 = vadd.f32 %v699_v59, %v644_v2  ;;  %v827_v59 = vpop.permute.xlu2 %826 }
 0x219   :  { %v709_v7 = vadd.f32 %v708_v62, %v700_v4  ;;  %v921_v62 = vadd.f32 %v920_v55, %v802_v20 }
 0x21e   :  { %v701_v6 = vpop.f32.mrf.mxu1 }
 0x21f   :  { %v702_v58 = vadd.f32 %v701_v6, %v649_v5  ;;  %v926_v5 = vadd.f32 %v925_v22, %v812_v47  ;;  %v832_v6 = vpop.permute.xlu2 %831 }
 0x221   :  { %v710_v8 = vadd.f32 %v709_v7, %v702_v58 }
 0x223   :  { %v711_v51 = vrot.slane %v710_v8, 4 }
 0x225   :  { %v712_v9 = vadd.f32 %v711_v51, %v710_v8 }
 0x227   :  { %v713_v15 = vrot.slane %v712_v9, 2 }
 0x229   :  { %v714_v16 = vadd.f32 %v713_v15, %v712_v9 }
 0x22b   :  { %v715_v44 = vrot.slane %v714_v16, 1 }
 0x22d   :  { %v716_v18 = vadd.f32 %v715_v44, %v714_v16  ;;  %v940_v16 = vmax.f32 %v921_v62, 0.0  ;;  %v942_v44 = vmax.f32 %v926_v5, 0.0 }
 0x22f   :  { %v717_v48 = vmul.f32 0.015625, %v716_v18 }
 0x231   :  { %v1611_v10 = vsub.f32 %v685_v50, %v717_v48  ;;  %v1613_v19 = vsub.f32 %v687_v49, %v717_v48  ;;  %v1615_v21 = vsub.f32 %v690_v52, %v717_v48  ;;  %v1617_v24 = vsub.f32 %v692_v57, %v717_v48  ;;  %v817_v50 = vpop.permute.xlu0 %816  ;;  %v822_v57 = vpop.permute.xlu1 %821 }
 0x232   :  { %v1623_v28 = vsub.f32 %v695_v61, %v717_v48  ;;  %v1627_v31 = vsub.f32 %v697_v1, %v717_v48  ;;  %v1631_v13 = vsub.f32 %v700_v4, %v717_v48  ;;  %v1635_v12 = vsub.f32 %v702_v58, %v717_v48 }
 0x233   :  { %v726_v25 = vmul.f32 %v1611_v10, %v1611_v10  ;;  %v727_v27 = vmul.f32 %v1613_v19, %v1613_v19  ;;  %v728_v29 = vmul.f32 %v1615_v21, %v1615_v21  ;;  %v729_v32 = vmul.f32 %v1617_v24, %v1617_v24 }
 0x234   :  { %v730_v14 = vmul.f32 %v1623_v28, %v1623_v28  ;;  %v731_v34 = vmul.f32 %v1627_v31, %v1627_v31  ;;  %v732_v37 = vmul.f32 %v1631_v13, %v1631_v13  ;;  %v733_v26 = vmul.f32 %v1635_v12, %v1635_v12 }
 0x235   :  { %v734_v30 = vadd.f32 %v727_v27, %v726_v25  ;;  %v923_v4 = vadd.f32 %v922_v53, %v807_v43  ;;  %v928_v7 = vadd.f32 %v927_v36, %v817_v50  ;;  %v931_v8 = vadd.f32 %v930_v41, %v822_v57  ;;  %v937_v27 = vpop.f32.mrf.mxu2 }
 0x236   :  { %v933_v48 = vadd.f32 %v932_v54, %v827_v59 }
 0x237   :  { %v735_v33 = vadd.f32 %v734_v30, %v728_v29  ;;  %v941_v15 = vmax.f32 %v923_v4, 0.0  ;;  %v943_v18 = vmax.f32 %v928_v7, 0.0  ;;  %v944_v30 = vmax.f32 %v931_v8, 0.0 }
 0x239   :  { %v736_v11 = vadd.f32 %v735_v33, %v729_v32  ;;  %v975_v60 = vpop.permute.xlu0 %974  ;;  %v980_v2 = vpop.permute.xlu1 %979  ;;  %v936_v32 = vadd.f32 %v935_v0, %v832_v6 }
 0x23b   :  { %v737_v35 = vadd.f32 %v736_v11, %v730_v14 }
 0x23d   :  { %v738_v23 = vadd.f32 %v737_v35, %v731_v34 }
 0x23f   :  { %v739_v38 = vadd.f32 %v738_v23, %v732_v37  ;;  %v945_v23 = vmax.f32 %v933_v48, 0.0 }
 0x241   :  { %v740_v17 = vadd.f32 %v739_v38, %v733_v26  ;;  %v985_v51 = vpop.permute.xlu0 %984  ;;  %v837_v11 = vpop.permute.xlu1 %836 }
 0x242   :  { %v938_v26 = vadd.f32 %v937_v27, %v837_v11 }
 0x243   :  { %v741_v39 = vrot.slane %v740_v17, 4 }
 0x244   :  { %v947_v43 = vmax.f32 %v938_v26, 0.0 }
 0x245   :  { %v742_v40 = vadd.f32 %v741_v39, %v740_v17  ;;  %v946_v39 = vmax.f32 %v936_v32, 0.0 }
 0x247   :  { %v743_v42 = vrot.slane %v742_v40, 2 }
 0x249   :  { %v744_v45 = vadd.f32 %v743_v42, %v742_v40  ;;  %v995_v42 = vpop.permute.xlu0 %994 }
 0x24b   :  { %v745_v46 = vrot.slane %v744_v45, 1 }
 0x24d   :  { %v746_v49 = vadd.f32 %v745_v46, %v744_v45 }
 0x24f   :  { %v747_v52 = vmul.f32 0.015625, %v746_v49 }
 0x251   :  { %v748_v56 = vadd.f32 1e-05, %v747_v52 }
 0x253   :  { %1227 = vrsqrt.f32 %v748_v56  ;;  %vm755_vm4 = vweird.f32 %v748_v56 }
 0x259   :  { %v1228_v61 = vpop.eup %1227 }
 0x25a   :  { %v750_v63 = vmul.f32 %v1228_v61, %v748_v56  ;;  %vm756_vm3 = vweird.f32 %v1228_v61 }
 0x25b   :  { %vm757_vm5 = vmor %vm755_vm4, %vm756_vm3 }
 0x25c   :  { %v751_v1 = vmul.f32 %v1228_v61, %v750_v63 }
 0x25e   :  { %v752_v3 = vmul.f32 0.5, %v751_v1 }
 0x260   :  { %v753_v58 = vsub.f32 1.5, %v752_v3  ;;  %v1010_v3 = vpop.permute.xlu0 %1009 }
 0x262   :  { %v754_v9 = vmul.f32 %v1228_v61, %v753_v58 }
 0x264   :  { %v758_v25 = vsel %vm757_vm5, %v1228_v61, %v754_v9  ;;  %v1000_v61 = vpop.permute.xlu1 %999  ;;  %v1034_v9 = vstv %s1666_s9 }
 0x265   :  { %v759_v53 = vmul.f32 %v758_v25, %v1611_v10  ;;  %v760_v55 = vmul.f32 %v758_v25, %v1613_v19  ;;  %v761_v22 = vmul.f32 %v758_v25, %v1615_v21  ;;  %v762_v29 = vmul.f32 %v758_v25, %v1617_v24  ;;  %v990_v24 = vpop.permute.xlu2 %989 }
 0x266   :  { %v763_v33 = vmul.f32 %v758_v25, %v1623_v28  ;;  %v764_v14 = vmul.f32 %v758_v25, %v1627_v31  ;;  %v765_v10 = vmul.f32 %v758_v25, %v1631_v13  ;;  %v766_v20 = vmul.f32 %v758_v25, %v1635_v12 }
 0x267   :  { %v948_v34 = vadd.f32 %v940_v16, %v759_v53  ;;  %v949_v35 = vadd.f32 %v941_v15, %v760_v55  ;;  %v950_v36 = vadd.f32 %v942_v44, %v761_v22  ;;  %v951_v37 = vadd.f32 %v943_v18, %v762_v29 }
 0x268   :  { %v952_v19 = vadd.f32 %v944_v30, %v763_v33  ;;  %v953_v28 = vadd.f32 %v945_v23, %v764_v14  ;;  %v954_v45 = vadd.f32 %v946_v39, %v765_v10  ;;  %v955_v50 = vadd.f32 %v947_v43, %v766_v20 }
 0x269   :  { %v956_v38 = vmax.f32 %v948_v34, 0.0  ;;  %v957_v21 = vmax.f32 %v949_v35, 0.0  ;;  %v958_v17 = vmax.f32 %v950_v36, 0.0  ;;  %v959_v40 = vmax.f32 %v951_v37, 0.0 }
 0x26a   :  { %v960_v46 = vmax.f32 %v952_v19, 0.0  ;;  %v961_v13 = vmax.f32 %v953_v28, 0.0  ;;  %v962_v56 = vmax.f32 %v954_v45, 0.0  ;;  %v963_v63 = vmax.f32 %v955_v50, 0.0 }
 0x26b   :  { %v1012_v31 = vmul.f32 %v975_v60, %v956_v38  ;;  %v1013_v41 = vmul.f32 %v980_v2, %v957_v21  ;;  %v1014_v47 = vmul.f32 %v985_v51, %v958_v17  ;;  %v1015_v52 = vmul.f32 %v990_v24, %v959_v40 }
 0x26c   :  { %v1016_v57 = vmul.f32 %v995_v42, %v960_v46  ;;  %v1017_v12 = vmul.f32 %v1000_v61, %v961_v13  ;;  %v1019_v4 = vmul.f32 %v1010_v3, %v963_v63 }
 0x26d   :  { %v1020_v49 = vadd.f32 %v1013_v41, %v1012_v31  ;;  %v1005_v1 = vpop.permute.xlu2 %1004 }
 0x26e   :  { %v1018_v60 = vmul.f32 %v1005_v1, %v962_v56 }
 0x26f   :  { %v1021_v54 = vadd.f32 %v1020_v49, %v1014_v47 }
 0x271   :  { %v1022_v59 = vadd.f32 %v1021_v54, %v1015_v52 }
 0x273   :  { %v1023_v0 = vadd.f32 %v1022_v59, %v1016_v57 }
 0x275   :  { %v1024_v2 = vadd.f32 %v1023_v0, %v1017_v12 }
 0x277   :  { %v1025_v62 = vadd.f32 %v1024_v2, %v1018_v60 }
 0x279   :  { %v1026_v5 = vadd.f32 %v1025_v62, %v1019_v4 }
 0x27b   :  { %v1027_v6 = vrot.slane %v1026_v5, 4 }
 0x27d   :  { %v1028_v7 = vadd.f32 %v1027_v6, %v1026_v5 }
 0x27f   :  { %v1029_v58 = vrot.slane %v1028_v7, 2 }
 0x281   :  { %v1030_v8 = vadd.f32 %v1029_v58, %v1028_v7 }
 0x283   :  { %v1031_v51 = vrot.slane %v1030_v8, 1 }
 0x285   :  { %v1032_v15 = vadd.f32 %v1031_v51, %v1030_v8 }
 0x287   :  { %v1035_v16 = vadd.f32 %v1034_v9, %v1032_v15 }
 0x289   :  { %1036 = vst [vmem:[%s1667_s10] sm:$0x1] %v1035_v16 }
 0x28a   :  { %1041 = vsyncpa [#allocation4], 1 }
 0x28b   :  { %1042 = vsyncpa [#allocation6], 1 }
 0x28c   :  { %1043 = vsyncpa [#allocation9], 1 }

</bundles_post_ra>
